<compile_context>
chip_gen: v5e
topology: v5e:2x2
jax: 0.10.0
libtpu: 0.0.40
codegen_flags: <defaults>
</compile_context>

<pallas_src>
import jax
import jax.numpy as jnp
from jax.experimental import pallas as pl
from jax.experimental.pallas import tpu as pltpu

EPS = 1e-5
_VMEM_BUDGET = 32 * 1024 * 1024  # safe scoped default on v5e/v6e/v7x


def _prob_disc_kernel(
    x_ref,
    w3, g3, be3,
    w4, g4, be4,
    w5, g5, be5,
    w6, g6, be6,
    wm, bm, ws, bs, ww, bw,
    mean_ref, std_ref, wgt_ref,
):
    n = x_ref.shape[0]
    inv_n = 1.0 / n
    x = x_ref[...].astype(jnp.float32)

    def layer(h, w_ref, g_ref, be_ref):
        # Linear (bias dropped: cancelled by training-mode BN mean subtraction)
        z = jnp.dot(h, w_ref[...], preferred_element_type=jnp.float32)
        # Single-sweep batch statistics (biased variance), then affine + ReLU.
        s = jnp.sum(z, axis=0, keepdims=True)
        sq = jnp.sum(z * z, axis=0, keepdims=True)
        mu = s * inv_n
        var = sq * inv_n - mu * mu
        zn = (z - mu) * jax.lax.rsqrt(var + EPS) * g_ref[...] + be_ref[...]
        return jnp.maximum(zn, 0.0)

    h = layer(x, w3, g3, be3)
    h = layer(h, w4, g4, be4)
    h = layer(h, w5, g5, be5)
    h = layer(h, w6, g6, be6)

    # mean head
    mean_ref[...] = (
        jnp.dot(h, wm[...], preferred_element_type=jnp.float32) + bm[...]
    ).astype(mean_ref.dtype)

    # std head: sigmoid(raw) * 2 + 0.1
    s_raw = jnp.dot(h, ws[...], preferred_element_type=jnp.float32) + bs[...]
    std_ref[...] = (2.0 / (1.0 + jnp.exp(-s_raw)) + 0.1).astype(std_ref.dtype)

    # weight head: softmax over the domain axis, one small dot per domain
    ndom = wgt_ref.shape[0]
    logits = [
        jnp.dot(h, ww[d], preferred_element_type=jnp.float32) + bw[d]
        for d in range(ndom)
    ]
    m = logits[0]
    for d in range(1, ndom):
        m = jnp.maximum(m, logits[d])
    exps = [jnp.exp(l - m) for l in logits]
    tot = exps[0]
    for d in range(1, ndom):
        tot = tot + exps[d]
    inv = 1.0 / tot
    for d in range(ndom):
        wgt_ref[d] = (exps[d] * inv).astype(wgt_ref.dtype)


def _vmem_bytes_estimate(n, nh, k):
    rows = ((n + 7) // 8) * 8
    lane = lambda f: ((f + 127) // 128) * 128
    act = rows * lane(nh) * 4 * 14          # input + BN-layer temporaries
    heads = rows * lane(k) * 4 * 6          # head logits / outputs / temps
    weights = 4 * (4 * nh * lane(nh) + 3 * nh * lane(k) + 16 * lane(nh) + 8 * lane(k))
    return act + heads + weights


def prob_disc_net(x, params, dim_domain, nmix):
    """x: (T, B, nh) or (N, nh). Returns (x_mean, x_std, x_weight)."""
    re = x.ndim == 3
    if re:
        T, B, _ = x.shape
        xf = x.reshape(T * B, -1)
    else:
        xf = x
    n, nh = xf.shape
    dm, nm = dim_domain, nmix
    k = dm * nm

    # Split fc_final into mean / std / per-domain weight heads (wrapper-side,
    # so the kernel never slices a non-lane-aligned feature axis).
    wf = params["wf"]                       # (nh, 3*k), cols ordered [mode, d, m]
    bf = params["bf"].reshape(-1)           # (3*k,)
    wm = wf[:, :k]
    ws = wf[:, k:2 * k]
    ww = wf[:, 2 * k:].reshape(nh, dm, nm).transpose(1, 0, 2)   # (dm, nh, nm)
    bm = bf[:k].reshape(1, k)
    bs = bf[k:2 * k].reshape(1, k)
    bw = bf[2 * k:].reshape(dm, 1, nm)

    # Full-batch BN statistics require whole-batch residency in VMEM; gate it.
    est = _vmem_bytes_estimate(n, nh, k)
    if est > (_VMEM_BUDGET * 3) // 4:
        # TODO(synk): fall back to a tiled stats-accumulate + normalize
        # two-pass kernel for large N (esp. on v7x's 64 MiB VMEM).
        raise NotImplementedError(
            f"batch too large for whole-batch VMEM residency ({est} bytes est.)"
        )

    args = [
        xf,
        params["w3"], params["g3"], params["be3"],
        params["w4"], params["g4"], params["be4"],
        params["w5"], params["g5"], params["be5"],
        params["w6"], params["g6"], params["be6"],
        wm, bm, ws, bs, ww, bw,
    ]

    vmem = pl.BlockSpec(memory_space=pltpu.MemorySpace.VMEM)
    flops = int(2 * n * nh * nh * 4 + 2 * n * nh * k * 3 + 30 * n * nh)
    transc = int(2 * n * k + 4 * nh)
    bytes_acc = int(4 * (n * nh + 3 * n * k + 4 * nh * nh + 3 * nh * k + 8 * nh + 3 * k))

    mean, std, wgt = pl.pallas_call(
        _prob_disc_kernel,
        out_shape=(
            jax.ShapeDtypeStruct((n, k), jnp.float32),
            jax.ShapeDtypeStruct((n, k), jnp.float32),
            jax.ShapeDtypeStruct((dm, n, nm), jnp.float32),
        ),
        in_specs=[vmem] * len(args),
        out_specs=(vmem, vmem, vmem),
        compiler_params=pltpu.CompilerParams(vmem_limit_bytes=_VMEM_BUDGET),
        cost_estimate=pl.CostEstimate(
            flops=flops, transcendentals=transc, bytes_accessed=bytes_acc),
    )(*args)

    # (dm, N, nm) -> (N, dm*nm) with column order [d*nm + m] (matches PyTorch).
    x_weight = jnp.transpose(wgt, (1, 0, 2)).reshape(n, k)

    if re:
        return (mean.reshape(T, B, -1), std.reshape(T, B, -1),
                x_weight.reshape(T, B, -1))
    return (mean.reshape(n, dm, nm), std.reshape(n, dm, nm),
            x_weight.reshape(n, dm, nm))


def init_params(key, nh, dim_domain, nmix):
    """Deterministic synthetic parameters; Linear weights pre-transposed to (in, out)."""
    nout = 3 * dim_domain * nmix
    keys = jax.random.split(key, 6)

    def lin(k, fan_in, fan_out):
        lim = 1.0 / jnp.sqrt(fan_in)
        kw, kb = jax.random.split(k)
        w = jax.random.uniform(kw, (fan_in, fan_out), jnp.float32, -lim, lim)
        b = jax.random.uniform(kb, (1, fan_out), jnp.float32, -lim, lim)
        return w, b

    p = {}
    p["w3"], p["b3"] = lin(keys[0], nh, nh)
    p["w4"], p["b4"] = lin(keys[1], nh, nh)
    p["w5"], p["b5"] = lin(keys[2], nh, nh)
    p["w6"], p["b6"] = lin(keys[3], nh, nh)
    p["wf"], p["bf"] = lin(keys[4], nh, nout)
    kg = jax.random.split(keys[5], 8)
    for idx, i in enumerate((3, 4, 5, 6)):
        # non-trivial gamma/beta to exercise the BN affine path
        p[f"g{i}"] = 1.0 + 0.1 * jax.random.normal(kg[2 * idx], (1, nh), jnp.float32)
        p[f"be{i}"] = 0.1 * jax.random.normal(kg[2 * idx + 1], (1, nh), jnp.float32)
    return p


def reference_forward(x, params, dim_domain, nmix):
    """Pure-JAX replica of the PyTorch forward (training-mode BN, with biases)."""
    re = x.ndim == 3
    if re:
        T, B, _ = x.shape
        xf = x.reshape(T * B, -1)
    else:
        xf = x
    dm, nm = dim_domain, nmix

    def bn(h, g, be):
        mu = h.mean(0, keepdims=True)
        var = ((h - mu) ** 2).mean(0, keepdims=True)
        return (h - mu) / jnp.sqrt(var + EPS) * g + be

    h = xf
    for i in (3, 4, 5, 6):
        h = jax.nn.relu(bn(h @ params[f"w{i}"] + params[f"b{i}"],
                           params[f"g{i}"], params[f"be{i}"]))
    out = (h @ params["wf"] + params["bf"]).reshape(-1, 3, dm, nm)
    x_mean = out[:, 0]
    x_std = jax.nn.sigmoid(out[:, 1]) * 2.0 + 0.1
    x_weight = jax.nn.softmax(out[:, 2], axis=1)
    if re:
        return (x_mean.reshape(T, B, -1), x_std.reshape(T, B, -1),
                x_weight.reshape(T, B, -1))
    return (x_mean, x_std, x_weight)


if __name__ == "__main__":
    nh, dim_domain, nmix = 32, 4, 8     # opt.nh, opt.dim_domain, opt.nmix
    T, B = 2, 8                          # 3-D input path (T, B, C)

    key = jax.random.PRNGKey(0)
    kx, kp = jax.random.split(key)
    x = jax.random.normal(kx, (T, B, nh), jnp.float32)
    params = init_params(kp, nh, dim_domain, nmix)

    mean_k, std_k, wgt_k = jax.block_until_ready(
        prob_disc_net(x, params, dim_domain, nmix))
    mean_r, std_r, wgt_r = reference_forward(x, params, dim_domain, nmix)

    for a, b, name in ((mean_k, mean_r, "mean"),
                       (std_k, std_r, "std"),
                       (wgt_k, wgt_r, "weight")):
        assert a.shape == b.shape, f"{name} shape mismatch {a.shape} vs {b.shape}"
        assert jnp.allclose(a, b, atol=1e-4, rtol=1e-4), f"{name} mismatch vs reference"

    # mixture weights must sum to 1 over the domain axis
    wsum = wgt_k.reshape(T, B, dim_domain, nmix).sum(axis=2)
    assert jnp.allclose(wsum, 1.0, atol=1e-4)
    # std is sigmoid*2 + 0.1, so strictly within (0.1, 2.1)
    assert bool(jnp.all(std_k >= 0.1)) and bool(jnp.all(std_k <= 2.1))

    print("KERNEL_OK")
</pallas_src>

<mosaic_0001>
module attributes {stable_mosaic.version = 11 : i64} {
  func.func @_prob_disc_kernel(%arg0: memref<16x32xf32, #tpu.memory_space<vmem>>, %arg1: memref<32x32xf32, #tpu.memory_space<vmem>>, %arg2: memref<1x32xf32, #tpu.memory_space<vmem>>, %arg3: memref<1x32xf32, #tpu.memory_space<vmem>>, %arg4: memref<32x32xf32, #tpu.memory_space<vmem>>, %arg5: memref<1x32xf32, #tpu.memory_space<vmem>>, %arg6: memref<1x32xf32, #tpu.memory_space<vmem>>, %arg7: memref<32x32xf32, #tpu.memory_space<vmem>>, %arg8: memref<1x32xf32, #tpu.memory_space<vmem>>, %arg9: memref<1x32xf32, #tpu.memory_space<vmem>>, %arg10: memref<32x32xf32, #tpu.memory_space<vmem>>, %arg11: memref<1x32xf32, #tpu.memory_space<vmem>>, %arg12: memref<1x32xf32, #tpu.memory_space<vmem>>, %arg13: memref<32x32xf32, #tpu.memory_space<vmem>>, %arg14: memref<1x32xf32, #tpu.memory_space<vmem>>, %arg15: memref<32x32xf32, #tpu.memory_space<vmem>>, %arg16: memref<1x32xf32, #tpu.memory_space<vmem>>, %arg17: memref<4x32x8xf32, #tpu.memory_space<vmem>>, %arg18: memref<4x1x8xf32, #tpu.memory_space<vmem>>, %arg19: memref<16x32xf32, #tpu.memory_space<vmem>>, %arg20: memref<16x32xf32, #tpu.memory_space<vmem>>, %arg21: memref<4x16x8xf32, #tpu.memory_space<vmem>>) attributes {dimension_semantics = [], scalar_prefetch = 0 : i64, scratch_operands = 0 : i64, tpu.core_type = #tpu.core_type<tc>} {
    %c0 = arith.constant 0 : index
    %c0_0 = arith.constant 0 : index
    %0 = vector.load %arg0[%c0, %c0_0] : memref<16x32xf32, #tpu.memory_space<vmem>>, vector<16x32xf32>
    %c0_1 = arith.constant 0 : index
    %c0_2 = arith.constant 0 : index
    %1 = vector.load %arg1[%c0_1, %c0_2] : memref<32x32xf32, #tpu.memory_space<vmem>>, vector<32x32xf32>
    %cst = arith.constant dense<0.000000e+00> : vector<16x32xf32>
    %2 = tpu.matmul %0, %1, %cst {dimension_numbers = #tpu.dot_dimension_numbers<[1], [0], [0], [1], [0, 0, 1, 1], [], []>} : vector<16x32xf32>, vector<32x32xf32>, vector<16x32xf32> -> vector<16x32xf32>
    %cst_3 = arith.constant dense<0.000000e+00> : vector<32xf32>
    %3 = vector.multi_reduction <add>, %2, %cst_3 [0] : vector<16x32xf32> to vector<32xf32>
    %4 = vector.shape_cast %3 : vector<32xf32> to vector<1x32xf32>
    %5 = arith.mulf %2, %2 : vector<16x32xf32>
    %cst_4 = arith.constant dense<0.000000e+00> : vector<32xf32>
    %6 = vector.multi_reduction <add>, %5, %cst_4 [0] : vector<16x32xf32> to vector<32xf32>
    %7 = vector.shape_cast %6 : vector<32xf32> to vector<1x32xf32>
    %cst_5 = arith.constant 6.250000e-02 : f32
    %8 = vector.broadcast %cst_5 : f32 to vector<1x32xf32>
    %9 = arith.mulf %4, %8 : vector<1x32xf32>
    %cst_6 = arith.constant 6.250000e-02 : f32
    %10 = vector.broadcast %cst_6 : f32 to vector<1x32xf32>
    %11 = arith.mulf %7, %10 : vector<1x32xf32>
    %12 = arith.mulf %9, %9 : vector<1x32xf32>
    %13 = arith.subf %11, %12 : vector<1x32xf32>
    %14 = vector.broadcast %9 : vector<1x32xf32> to vector<16x32xf32>
    %15 = arith.subf %2, %14 : vector<16x32xf32>
    %cst_7 = arith.constant 9.99999974E-6 : f32
    %16 = vector.broadcast %cst_7 : f32 to vector<1x32xf32>
    %17 = arith.addf %13, %16 : vector<1x32xf32>
    %18 = math.rsqrt %17 : vector<1x32xf32>
    %19 = vector.broadcast %18 : vector<1x32xf32> to vector<16x32xf32>
    %20 = arith.mulf %15, %19 : vector<16x32xf32>
    %c0_8 = arith.constant 0 : index
    %c0_9 = arith.constant 0 : index
    %21 = vector.load %arg2[%c0_8, %c0_9] : memref<1x32xf32, #tpu.memory_space<vmem>>, vector<1x32xf32>
    %22 = vector.broadcast %21 : vector<1x32xf32> to vector<16x32xf32>
    %23 = arith.mulf %20, %22 : vector<16x32xf32>
    %c0_10 = arith.constant 0 : index
    %c0_11 = arith.constant 0 : index
    %24 = vector.load %arg3[%c0_10, %c0_11] : memref<1x32xf32, #tpu.memory_space<vmem>>, vector<1x32xf32>
    %25 = vector.broadcast %24 : vector<1x32xf32> to vector<16x32xf32>
    %26 = arith.addf %23, %25 : vector<16x32xf32>
    %cst_12 = arith.constant 0.000000e+00 : f32
    %27 = vector.broadcast %cst_12 : f32 to vector<16x32xf32>
    %28 = arith.maximumf %26, %27 : vector<16x32xf32>
    %c0_13 = arith.constant 0 : index
    %c0_14 = arith.constant 0 : index
    %29 = vector.load %arg4[%c0_13, %c0_14] : memref<32x32xf32, #tpu.memory_space<vmem>>, vector<32x32xf32>
    %cst_15 = arith.constant dense<0.000000e+00> : vector<16x32xf32>
    %30 = tpu.matmul %28, %29, %cst_15 {dimension_numbers = #tpu.dot_dimension_numbers<[1], [0], [0], [1], [0, 0, 1, 1], [], []>} : vector<16x32xf32>, vector<32x32xf32>, vector<16x32xf32> -> vector<16x32xf32>
    %cst_16 = arith.constant dense<0.000000e+00> : vector<32xf32>
    %31 = vector.multi_reduction <add>, %30, %cst_16 [0] : vector<16x32xf32> to vector<32xf32>
    %32 = vector.shape_cast %31 : vector<32xf32> to vector<1x32xf32>
    %33 = arith.mulf %30, %30 : vector<16x32xf32>
    %cst_17 = arith.constant dense<0.000000e+00> : vector<32xf32>
    %34 = vector.multi_reduction <add>, %33, %cst_17 [0] : vector<16x32xf32> to vector<32xf32>
    %35 = vector.shape_cast %34 : vector<32xf32> to vector<1x32xf32>
    %cst_18 = arith.constant 6.250000e-02 : f32
    %36 = vector.broadcast %cst_18 : f32 to vector<1x32xf32>
    %37 = arith.mulf %32, %36 : vector<1x32xf32>
    %cst_19 = arith.constant 6.250000e-02 : f32
    %38 = vector.broadcast %cst_19 : f32 to vector<1x32xf32>
    %39 = arith.mulf %35, %38 : vector<1x32xf32>
    %40 = arith.mulf %37, %37 : vector<1x32xf32>
    %41 = arith.subf %39, %40 : vector<1x32xf32>
    %42 = vector.broadcast %37 : vector<1x32xf32> to vector<16x32xf32>
    %43 = arith.subf %30, %42 : vector<16x32xf32>
    %cst_20 = arith.constant 9.99999974E-6 : f32
    %44 = vector.broadcast %cst_20 : f32 to vector<1x32xf32>
    %45 = arith.addf %41, %44 : vector<1x32xf32>
    %46 = math.rsqrt %45 : vector<1x32xf32>
    %47 = vector.broadcast %46 : vector<1x32xf32> to vector<16x32xf32>
    %48 = arith.mulf %43, %47 : vector<16x32xf32>
    %c0_21 = arith.constant 0 : index
    %c0_22 = arith.constant 0 : index
    %49 = vector.load %arg5[%c0_21, %c0_22] : memref<1x32xf32, #tpu.memory_space<vmem>>, vector<1x32xf32>
    %50 = vector.broadcast %49 : vector<1x32xf32> to vector<16x32xf32>
    %51 = arith.mulf %48, %50 : vector<16x32xf32>
    %c0_23 = arith.constant 0 : index
    %c0_24 = arith.constant 0 : index
    %52 = vector.load %arg6[%c0_23, %c0_24] : memref<1x32xf32, #tpu.memory_space<vmem>>, vector<1x32xf32>
    %53 = vector.broadcast %52 : vector<1x32xf32> to vector<16x32xf32>
    %54 = arith.addf %51, %53 : vector<16x32xf32>
    %cst_25 = arith.constant 0.000000e+00 : f32
    %55 = vector.broadcast %cst_25 : f32 to vector<16x32xf32>
    %56 = arith.maximumf %54, %55 : vector<16x32xf32>
    %c0_26 = arith.constant 0 : index
    %c0_27 = arith.constant 0 : index
    %57 = vector.load %arg7[%c0_26, %c0_27] : memref<32x32xf32, #tpu.memory_space<vmem>>, vector<32x32xf32>
    %cst_28 = arith.constant dense<0.000000e+00> : vector<16x32xf32>
    %58 = tpu.matmul %56, %57, %cst_28 {dimension_numbers = #tpu.dot_dimension_numbers<[1], [0], [0], [1], [0, 0, 1, 1], [], []>} : vector<16x32xf32>, vector<32x32xf32>, vector<16x32xf32> -> vector<16x32xf32>
    %cst_29 = arith.constant dense<0.000000e+00> : vector<32xf32>
    %59 = vector.multi_reduction <add>, %58, %cst_29 [0] : vector<16x32xf32> to vector<32xf32>
    %60 = vector.shape_cast %59 : vector<32xf32> to vector<1x32xf32>
    %61 = arith.mulf %58, %58 : vector<16x32xf32>
    %cst_30 = arith.constant dense<0.000000e+00> : vector<32xf32>
    %62 = vector.multi_reduction <add>, %61, %cst_30 [0] : vector<16x32xf32> to vector<32xf32>
    %63 = vector.shape_cast %62 : vector<32xf32> to vector<1x32xf32>
    %cst_31 = arith.constant 6.250000e-02 : f32
    %64 = vector.broadcast %cst_31 : f32 to vector<1x32xf32>
    %65 = arith.mulf %60, %64 : vector<1x32xf32>
    %cst_32 = arith.constant 6.250000e-02 : f32
    %66 = vector.broadcast %cst_32 : f32 to vector<1x32xf32>
    %67 = arith.mulf %63, %66 : vector<1x32xf32>
    %68 = arith.mulf %65, %65 : vector<1x32xf32>
    %69 = arith.subf %67, %68 : vector<1x32xf32>
    %70 = vector.broadcast %65 : vector<1x32xf32> to vector<16x32xf32>
    %71 = arith.subf %58, %70 : vector<16x32xf32>
    %cst_33 = arith.constant 9.99999974E-6 : f32
    %72 = vector.broadcast %cst_33 : f32 to vector<1x32xf32>
    %73 = arith.addf %69, %72 : vector<1x32xf32>
    %74 = math.rsqrt %73 : vector<1x32xf32>
    %75 = vector.broadcast %74 : vector<1x32xf32> to vector<16x32xf32>
    %76 = arith.mulf %71, %75 : vector<16x32xf32>
    %c0_34 = arith.constant 0 : index
    %c0_35 = arith.constant 0 : index
    %77 = vector.load %arg8[%c0_34, %c0_35] : memref<1x32xf32, #tpu.memory_space<vmem>>, vector<1x32xf32>
    %78 = vector.broadcast %77 : vector<1x32xf32> to vector<16x32xf32>
    %79 = arith.mulf %76, %78 : vector<16x32xf32>
    %c0_36 = arith.constant 0 : index
    %c0_37 = arith.constant 0 : index
    %80 = vector.load %arg9[%c0_36, %c0_37] : memref<1x32xf32, #tpu.memory_space<vmem>>, vector<1x32xf32>
    %81 = vector.broadcast %80 : vector<1x32xf32> to vector<16x32xf32>
    %82 = arith.addf %79, %81 : vector<16x32xf32>
    %cst_38 = arith.constant 0.000000e+00 : f32
    %83 = vector.broadcast %cst_38 : f32 to vector<16x32xf32>
    %84 = arith.maximumf %82, %83 : vector<16x32xf32>
    %c0_39 = arith.constant 0 : index
    %c0_40 = arith.constant 0 : index
    %85 = vector.load %arg10[%c0_39, %c0_40] : memref<32x32xf32, #tpu.memory_space<vmem>>, vector<32x32xf32>
    %cst_41 = arith.constant dense<0.000000e+00> : vector<16x32xf32>
    %86 = tpu.matmul %84, %85, %cst_41 {dimension_numbers = #tpu.dot_dimension_numbers<[1], [0], [0], [1], [0, 0, 1, 1], [], []>} : vector<16x32xf32>, vector<32x32xf32>, vector<16x32xf32> -> vector<16x32xf32>
    %cst_42 = arith.constant dense<0.000000e+00> : vector<32xf32>
    %87 = vector.multi_reduction <add>, %86, %cst_42 [0] : vector<16x32xf32> to vector<32xf32>
    %88 = vector.shape_cast %87 : vector<32xf32> to vector<1x32xf32>
    %89 = arith.mulf %86, %86 : vector<16x32xf32>
    %cst_43 = arith.constant dense<0.000000e+00> : vector<32xf32>
    %90 = vector.multi_reduction <add>, %89, %cst_43 [0] : vector<16x32xf32> to vector<32xf32>
    %91 = vector.shape_cast %90 : vector<32xf32> to vector<1x32xf32>
    %cst_44 = arith.constant 6.250000e-02 : f32
    %92 = vector.broadcast %cst_44 : f32 to vector<1x32xf32>
    %93 = arith.mulf %88, %92 : vector<1x32xf32>
    %cst_45 = arith.constant 6.250000e-02 : f32
    %94 = vector.broadcast %cst_45 : f32 to vector<1x32xf32>
    %95 = arith.mulf %91, %94 : vector<1x32xf32>
    %96 = arith.mulf %93, %93 : vector<1x32xf32>
    %97 = arith.subf %95, %96 : vector<1x32xf32>
    %98 = vector.broadcast %93 : vector<1x32xf32> to vector<16x32xf32>
    %99 = arith.subf %86, %98 : vector<16x32xf32>
    %cst_46 = arith.constant 9.99999974E-6 : f32
    %100 = vector.broadcast %cst_46 : f32 to vector<1x32xf32>
    %101 = arith.addf %97, %100 : vector<1x32xf32>
    %102 = math.rsqrt %101 : vector<1x32xf32>
    %103 = vector.broadcast %102 : vector<1x32xf32> to vector<16x32xf32>
    %104 = arith.mulf %99, %103 : vector<16x32xf32>
    %c0_47 = arith.constant 0 : index
    %c0_48 = arith.constant 0 : index
    %105 = vector.load %arg11[%c0_47, %c0_48] : memref<1x32xf32, #tpu.memory_space<vmem>>, vector<1x32xf32>
    %106 = vector.broadcast %105 : vector<1x32xf32> to vector<16x32xf32>
    %107 = arith.mulf %104, %106 : vector<16x32xf32>
    %c0_49 = arith.constant 0 : index
    %c0_50 = arith.constant 0 : index
    %108 = vector.load %arg12[%c0_49, %c0_50] : memref<1x32xf32, #tpu.memory_space<vmem>>, vector<1x32xf32>
    %109 = vector.broadcast %108 : vector<1x32xf32> to vector<16x32xf32>
    %110 = arith.addf %107, %109 : vector<16x32xf32>
    %cst_51 = arith.constant 0.000000e+00 : f32
    %111 = vector.broadcast %cst_51 : f32 to vector<16x32xf32>
    %112 = arith.maximumf %110, %111 : vector<16x32xf32>
    %c0_52 = arith.constant 0 : index
    %c0_53 = arith.constant 0 : index
    %113 = vector.load %arg13[%c0_52, %c0_53] : memref<32x32xf32, #tpu.memory_space<vmem>>, vector<32x32xf32>
    %cst_54 = arith.constant dense<0.000000e+00> : vector<16x32xf32>
    %114 = tpu.matmul %112, %113, %cst_54 {dimension_numbers = #tpu.dot_dimension_numbers<[1], [0], [0], [1], [0, 0, 1, 1], [], []>} : vector<16x32xf32>, vector<32x32xf32>, vector<16x32xf32> -> vector<16x32xf32>
    %c0_55 = arith.constant 0 : index
    %c0_56 = arith.constant 0 : index
    %115 = vector.load %arg14[%c0_55, %c0_56] : memref<1x32xf32, #tpu.memory_space<vmem>>, vector<1x32xf32>
    %116 = vector.broadcast %115 : vector<1x32xf32> to vector<16x32xf32>
    %117 = arith.addf %114, %116 : vector<16x32xf32>
    %c0_57 = arith.constant 0 : index
    %c0_58 = arith.constant 0 : index
    %118 = vector.load %arg19[%c0_57, %c0_58] : memref<16x32xf32, #tpu.memory_space<vmem>>, vector<16x32xf32>
    tpu.vector_store %arg19[%c0_57, %c0_58], %117 {strides = array<i32>} : memref<16x32xf32, #tpu.memory_space<vmem>>, vector<16x32xf32>,
    %c0_59 = arith.constant 0 : index
    %c0_60 = arith.constant 0 : index
    %119 = vector.load %arg15[%c0_59, %c0_60] : memref<32x32xf32, #tpu.memory_space<vmem>>, vector<32x32xf32>
    %cst_61 = arith.constant dense<0.000000e+00> : vector<16x32xf32>
    %120 = tpu.matmul %112, %119, %cst_61 {dimension_numbers = #tpu.dot_dimension_numbers<[1], [0], [0], [1], [0, 0, 1, 1], [], []>} : vector<16x32xf32>, vector<32x32xf32>, vector<16x32xf32> -> vector<16x32xf32>
    %c0_62 = arith.constant 0 : index
    %c0_63 = arith.constant 0 : index
    %121 = vector.load %arg16[%c0_62, %c0_63] : memref<1x32xf32, #tpu.memory_space<vmem>>, vector<1x32xf32>
    %122 = vector.broadcast %121 : vector<1x32xf32> to vector<16x32xf32>
    %123 = arith.addf %120, %122 : vector<16x32xf32>
    %cst_64 = arith.constant 0.000000e+00 : f32
    %124 = vector.broadcast %cst_64 : f32 to vector<16x32xf32>
    %125 = arith.subf %124, %123 : vector<16x32xf32>
    %126 = math.exp %125 : vector<16x32xf32>
    %cst_65 = arith.constant 1.000000e+00 : f32
    %127 = vector.broadcast %cst_65 : f32 to vector<16x32xf32>
    %128 = arith.addf %127, %126 : vector<16x32xf32>
    %cst_66 = arith.constant 2.000000e+00 : f32
    %129 = vector.broadcast %cst_66 : f32 to vector<16x32xf32>
    %130 = arith.divf %129, %128 : vector<16x32xf32>
    %cst_67 = arith.constant 1.000000e-01 : f32
    %131 = vector.broadcast %cst_67 : f32 to vector<16x32xf32>
    %132 = arith.addf %130, %131 : vector<16x32xf32>
    %c0_68 = arith.constant 0 : index
    %c0_69 = arith.constant 0 : index
    %133 = vector.load %arg20[%c0_68, %c0_69] : memref<16x32xf32, #tpu.memory_space<vmem>>, vector<16x32xf32>
    tpu.vector_store %arg20[%c0_68, %c0_69], %132 {strides = array<i32>} : memref<16x32xf32, #tpu.memory_space<vmem>>, vector<16x32xf32>,
    %c0_70 = arith.constant 0 : index
    %c0_71 = arith.constant 0 : index
    %c0_72 = arith.constant 0 : index
    %134 = vector.load %arg17[%c0_70, %c0_71, %c0_72] : memref<4x32x8xf32, #tpu.memory_space<vmem>>, vector<1x32x8xf32>
    %135 = vector.shape_cast %134 : vector<1x32x8xf32> to vector<32x8xf32>
    %cst_73 = arith.constant dense<0.000000e+00> : vector<16x8xf32>
    %136 = tpu.matmul %112, %135, %cst_73 {dimension_numbers = #tpu.dot_dimension_numbers<[1], [0], [0], [1], [0, 0, 1, 1], [], []>} : vector<16x32xf32>, vector<32x8xf32>, vector<16x8xf32> -> vector<16x8xf32>
    %c0_74 = arith.constant 0 : index
    %c0_75 = arith.constant 0 : index
    %c0_76 = arith.constant 0 : index
    %137 = vector.load %arg18[%c0_74, %c0_75, %c0_76] : memref<4x1x8xf32, #tpu.memory_space<vmem>>, vector<1x1x8xf32>
    %138 = vector.shape_cast %137 : vector<1x1x8xf32> to vector<1x8xf32>
    %139 = vector.broadcast %138 : vector<1x8xf32> to vector<16x8xf32>
    %140 = arith.addf %136, %139 : vector<16x8xf32>
    %c1 = arith.constant 1 : index
    %c0_77 = arith.constant 0 : index
    %c0_78 = arith.constant 0 : index
    %141 = vector.load %arg17[%c1, %c0_77, %c0_78] : memref<4x32x8xf32, #tpu.memory_space<vmem>>, vector<1x32x8xf32>
    %142 = vector.shape_cast %141 : vector<1x32x8xf32> to vector<32x8xf32>
    %cst_79 = arith.constant dense<0.000000e+00> : vector<16x8xf32>
    %143 = tpu.matmul %112, %142, %cst_79 {dimension_numbers = #tpu.dot_dimension_numbers<[1], [0], [0], [1], [0, 0, 1, 1], [], []>} : vector<16x32xf32>, vector<32x8xf32>, vector<16x8xf32> -> vector<16x8xf32>
    %c1_80 = arith.constant 1 : index
    %c0_81 = arith.constant 0 : index
    %c0_82 = arith.constant 0 : index
    %144 = vector.load %arg18[%c1_80, %c0_81, %c0_82] : memref<4x1x8xf32, #tpu.memory_space<vmem>>, vector<1x1x8xf32>
    %145 = vector.shape_cast %144 : vector<1x1x8xf32> to vector<1x8xf32>
    %146 = vector.broadcast %145 : vector<1x8xf32> to vector<16x8xf32>
    %147 = arith.addf %143, %146 : vector<16x8xf32>
    %c2 = arith.constant 2 : index
    %c0_83 = arith.constant 0 : index
    %c0_84 = arith.constant 0 : index
    %148 = vector.load %arg17[%c2, %c0_83, %c0_84] : memref<4x32x8xf32, #tpu.memory_space<vmem>>, vector<1x32x8xf32>
    %149 = vector.shape_cast %148 : vector<1x32x8xf32> to vector<32x8xf32>
    %cst_85 = arith.constant dense<0.000000e+00> : vector<16x8xf32>
    %150 = tpu.matmul %112, %149, %cst_85 {dimension_numbers = #tpu.dot_dimension_numbers<[1], [0], [0], [1], [0, 0, 1, 1], [], []>} : vector<16x32xf32>, vector<32x8xf32>, vector<16x8xf32> -> vector<16x8xf32>
    %c2_86 = arith.constant 2 : index
    %c0_87 = arith.constant 0 : index
    %c0_88 = arith.constant 0 : index
    %151 = vector.load %arg18[%c2_86, %c0_87, %c0_88] : memref<4x1x8xf32, #tpu.memory_space<vmem>>, vector<1x1x8xf32>
    %152 = vector.shape_cast %151 : vector<1x1x8xf32> to vector<1x8xf32>
    %153 = vector.broadcast %152 : vector<1x8xf32> to vector<16x8xf32>
    %154 = arith.addf %150, %153 : vector<16x8xf32>
    %c3 = arith.constant 3 : index
    %c0_89 = arith.constant 0 : index
    %c0_90 = arith.constant 0 : index
    %155 = vector.load %arg17[%c3, %c0_89, %c0_90] : memref<4x32x8xf32, #tpu.memory_space<vmem>>, vector<1x32x8xf32>
    %156 = vector.shape_cast %155 : vector<1x32x8xf32> to vector<32x8xf32>
    %cst_91 = arith.constant dense<0.000000e+00> : vector<16x8xf32>
    %157 = tpu.matmul %112, %156, %cst_91 {dimension_numbers = #tpu.dot_dimension_numbers<[1], [0], [0], [1], [0, 0, 1, 1], [], []>} : vector<16x32xf32>, vector<32x8xf32>, vector<16x8xf32> -> vector<16x8xf32>
    %c3_92 = arith.constant 3 : index
    %c0_93 = arith.constant 0 : index
    %c0_94 = arith.constant 0 : index
    %158 = vector.load %arg18[%c3_92, %c0_93, %c0_94] : memref<4x1x8xf32, #tpu.memory_space<vmem>>, vector<1x1x8xf32>
    %159 = vector.shape_cast %158 : vector<1x1x8xf32> to vector<1x8xf32>
    %160 = vector.broadcast %159 : vector<1x8xf32> to vector<16x8xf32>
    %161 = arith.addf %157, %160 : vector<16x8xf32>
    %162 = arith.maximumf %140, %147 : vector<16x8xf32>
    %163 = arith.maximumf %162, %154 : vector<16x8xf32>
    %164 = arith.maximumf %163, %161 : vector<16x8xf32>
    %165 = arith.subf %140, %164 : vector<16x8xf32>
    %166 = math.exp %165 : vector<16x8xf32>
    %167 = arith.subf %147, %164 : vector<16x8xf32>
    %168 = math.exp %167 : vector<16x8xf32>
    %169 = arith.subf %154, %164 : vector<16x8xf32>
    %170 = math.exp %169 : vector<16x8xf32>
    %171 = arith.subf %161, %164 : vector<16x8xf32>
    %172 = math.exp %171 : vector<16x8xf32>
    %173 = arith.addf %166, %168 : vector<16x8xf32>
    %174 = arith.addf %173, %170 : vector<16x8xf32>
    %175 = arith.addf %174, %172 : vector<16x8xf32>
    %cst_95 = arith.constant 1.000000e+00 : f32
    %176 = vector.broadcast %cst_95 : f32 to vector<16x8xf32>
    %177 = arith.divf %176, %175 : vector<16x8xf32>
    %178 = arith.mulf %166, %177 : vector<16x8xf32>
    %c0_96 = arith.constant 0 : index
    %c0_97 = arith.constant 0 : index
    %c0_98 = arith.constant 0 : index
    %179 = vector.load %arg21[%c0_96, %c0_97, %c0_98] : memref<4x16x8xf32, #tpu.memory_space<vmem>>, vector<1x16x8xf32>
    %180 = vector.shape_cast %179 : vector<1x16x8xf32> to vector<16x8xf32>
    %181 = vector.shape_cast %178 : vector<16x8xf32> to vector<1x16x8xf32>
    tpu.vector_store %arg21[%c0_96, %c0_97, %c0_98], %181 {strides = array<i32>} : memref<4x16x8xf32, #tpu.memory_space<vmem>>, vector<1x16x8xf32>,
    %182 = arith.mulf %168, %177 : vector<16x8xf32>
    %c1_99 = arith.constant 1 : index
    %c0_100 = arith.constant 0 : index
    %c0_101 = arith.constant 0 : index
    %183 = vector.load %arg21[%c1_99, %c0_100, %c0_101] : memref<4x16x8xf32, #tpu.memory_space<vmem>>, vector<1x16x8xf32>
    %184 = vector.shape_cast %183 : vector<1x16x8xf32> to vector<16x8xf32>
    %185 = vector.shape_cast %182 : vector<16x8xf32> to vector<1x16x8xf32>
    tpu.vector_store %arg21[%c1_99, %c0_100, %c0_101], %185 {strides = array<i32>} : memref<4x16x8xf32, #tpu.memory_space<vmem>>, vector<1x16x8xf32>,
    %186 = arith.mulf %170, %177 : vector<16x8xf32>
    %c2_102 = arith.constant 2 : index
    %c0_103 = arith.constant 0 : index
    %c0_104 = arith.constant 0 : index
    %187 = vector.load %arg21[%c2_102, %c0_103, %c0_104] : memref<4x16x8xf32, #tpu.memory_space<vmem>>, vector<1x16x8xf32>
    %188 = vector.shape_cast %187 : vector<1x16x8xf32> to vector<16x8xf32>
    %189 = vector.shape_cast %186 : vector<16x8xf32> to vector<1x16x8xf32>
    tpu.vector_store %arg21[%c2_102, %c0_103, %c0_104], %189 {strides = array<i32>} : memref<4x16x8xf32, #tpu.memory_space<vmem>>, vector<1x16x8xf32>,
    %190 = arith.mulf %172, %177 : vector<16x8xf32>
    %c3_105 = arith.constant 3 : index
    %c0_106 = arith.constant 0 : index
    %c0_107 = arith.constant 0 : index
    %191 = vector.load %arg21[%c3_105, %c0_106, %c0_107] : memref<4x16x8xf32, #tpu.memory_space<vmem>>, vector<1x16x8xf32>
    %192 = vector.shape_cast %191 : vector<1x16x8xf32> to vector<16x8xf32>
    %193 = vector.shape_cast %190 : vector<16x8xf32> to vector<1x16x8xf32>
    tpu.vector_store %arg21[%c3_105, %c0_106, %c0_107], %193 {strides = array<i32>} : memref<4x16x8xf32, #tpu.memory_space<vmem>>, vector<1x16x8xf32>,
    return
  }
}

</mosaic_0001>

<bundles_post_ra>
// kernel: tpu_custom_call.1
= control target key start
LH: loop header
LB: loop body
LE: loop exit
PB: predicated region body
PF: predicated region fallthrough
CT: control target
= control target key end

     0   :  { %s1531_s0 = inlined_call_operand.hbm [shape: f32[16,32], index: 0, kind: input, shape index: {}]   ;;  %s1532_s1 = inlined_call_operand.vmem [shape: f32[32,32], index: 1, kind: input, shape index: {}]   ;;  %s1533_s2 = inlined_call_operand.vmem [shape: f32[1,32], index: 2, kind: input, shape index: {}]   ;;  %s1534_s3 = inlined_call_operand.hbm [shape: f32[1,32], index: 3, kind: input, shape index: {}]   ;;  %s1535_s4 = inlined_call_operand.vmem [shape: f32[32,32], index: 4, kind: input, shape index: {}]   ;;  %s1536_s5 = inlined_call_operand.hbm [shape: f32[1,32], index: 5, kind: input, shape index: {}]   ;;  %s1537_s6 = inlined_call_operand.hbm [shape: f32[1,32], index: 6, kind: input, shape index: {}]   ;;  %s1538_s7 = inlined_call_operand.vmem [shape: f32[32,32], index: 7, kind: input, shape index: {}]   ;;  %s1539_s8 = inlined_call_operand.vmem [shape: f32[1,32], index: 8, kind: input, shape index: {}]   ;;  %s1540_s9 = inlined_call_operand.vmem [shape: f32[1,32], index: 9, kind: input, shape index: {}]   ;;  %s1541_s10 = inlined_call_operand.vmem [shape: f32[32,32], index: 10, kind: input, shape index: {}]   ;;  %s1542_s11 = inlined_call_operand.vmem [shape: f32[1,32], index: 11, kind: input, shape index: {}]   ;;  %s1543_s12 = inlined_call_operand.vmem [shape: f32[1,32], index: 12, kind: input, shape index: {}]   ;;  %s1544_s13 = inlined_call_operand.vmem [shape: f32[32,32], index: 13, kind: input, shape index: {}]   ;;  %s1545_s14 = inlined_call_operand.vmem [shape: f32[1,32], index: 14, kind: input, shape index: {}]   ;;  %s1546_s15 = inlined_call_operand.hbm [shape: f32[32,32], index: 15, kind: input, shape index: {}]   ;;  %s1547_s16 = inlined_call_operand.vmem [shape: f32[1,32], index: 16, kind: input, shape index: {}]   ;;  %s1548_s17 = inlined_call_operand.vmem [shape: f32[4,32,8], index: 17, kind: input, shape index: {}]   ;;  %s1549_s18 = inlined_call_operand.vmem [shape: f32[4,1,8], index: 18, kind: input, shape index: {}]   ;;  %s1550_s19 = inlined_call_operand.hbm [shape: f32[16,32], index: 19, kind: output, shape index: {0}]   ;;  %s1551_s20 = inlined_call_operand.hbm [shape: f32[16,32], index: 20, kind: output, shape index: {1}]   ;;  %s1552_s21 = inlined_call_operand.vmem [shape: f32[4,16,8], index: 21, kind: output, shape index: {2}]  }
   0x1   :  { %1556 = sst [smem:[#allocation19_spill]] %s1531_s0 }
   0x2   :  { %1557 = sst [smem:[#allocation20_spill]] %s1532_s1 }
   0x3   :  { %1558 = sst [smem:[#allocation21_spill]] %s1533_s2 }
   0x4   :  { %1559 = sst [smem:[#allocation22_spill]] %s1534_s3 }
   0x5   :  { %1560 = sst [smem:[#allocation23_spill]] %s1535_s4 }
   0x6   :  { %1561 = sst [smem:[#allocation24_spill]] %s1536_s5 }
   0x7   :  { %1562 = sst [smem:[#allocation25_spill]] %s1551_s20 }
   0x8   :  { %1563 = sst [smem:[#allocation26_spill]] %s1552_s21 }
   0x9   :  { %27 = vsyncpa [#allocation3], 0 }
   0xa   :  { %28 = vsyncpa [#allocation6], 0 }
   0xb   :  { %29 = vsyncpa [#allocation9], 0 }
   0xc   :  { %30 = vsyncpa [#allocation4], 0  ;;  %s1564_s26 = sld [smem:[#allocation22_spill]] }
  0x12   :  { %s54_s27 = sshll.u32 %s1564_s26, 4  ;;  %s55_s27 = int_to_ptr.hbm [resolvable:$true] %s54_s27 }
  0x13   :  { %31 = vsyncpa [#allocation13], 0  ;;  %s1143_s3 = smov [#allocation5]   ;;  %s78_s4 = sshll.u32 %s1537_s6, 4  ;;  %s79_s4 = int_to_ptr.hbm [resolvable:$true] %s78_s4 }
  0x14   :  { %s56_s28 = sshll.u32 %s1143_s3, 4  ;;  %s1144_s30 = smov [#allocation8]   ;;  %s57_s28 = int_to_ptr.vmem [resolvable:$true] %s56_s28 }
  0x15   :  { %59 = dma.hbm_to_vmem [thread:$0]  %s55_s27, 16, %s57_s28, [#allocation6]  }
  0x16   :  { %s80_s5 = sshll.u32 %s1144_s30, 4  ;;  %s1565_s1 = sld [smem:[#allocation19_spill]]  ;;  %s81_s5 = int_to_ptr.vmem [resolvable:$true] %s80_s5 }
  0x17   :  { %83 = dma.hbm_to_vmem [thread:$0]  %s79_s4, 16, %s81_s5, [#allocation9]  }
  0x18   :  { %s1145_s2 = smov [#allocation2]   ;;  %s1566_s21 = sld [smem:[#allocation24_spill]] }
  0x19   :  { %s38_s25 = sshll.u32 %s1145_s2, 4  ;;  %s1146_s29 = smov 128   ;;  %s39_s25 = int_to_ptr.vmem [resolvable:$true] %s38_s25 }
  0x1a   :  { %s1147_s6 = smov 8   ;;  %s1148_s27 = smov [#allocation7]  }
  0x1b   :  { %s69_s28 = sshll.u32 %s1148_s27, 4  ;;  %s104_s4 = sshll.u32 %s1546_s15, 4  ;;  %s70_s28 = int_to_ptr.vmem [resolvable:$true] %s69_s28  ;;  %s105_s4 = int_to_ptr.hbm [resolvable:$true] %s104_s4 }
  0x1c   :  { %s36_s24 = sshll.u32 %s1565_s1, 4  ;;  %s1149_s5 = smov [#allocation10]   ;;  %s37_s24 = int_to_ptr.hbm [resolvable:$true] %s36_s24 }
  0x1d   :  { %44 = dma.hbm_to_vmem [thread:$0]  %s37_s24, 256, %s39_s25, [#allocation3], %s1146_s29, %s1146_s29, %s1147_s6  }
  0x1e   :  { %s67_s20 = sshll.u32 %s1566_s21, 4  ;;  %s106_s22 = sshll.u32 %s1149_s5, 4  ;;  %s68_s20 = int_to_ptr.hbm [resolvable:$true] %s67_s20  ;;  %s107_s22 = int_to_ptr.vmem [resolvable:$true] %s106_s22 }
  0x1f   :  { %72 = dma.hbm_to_vmem [thread:$0]  %s68_s20, 16, %s70_s28, [#allocation6]  }
  0x20   :  { %112 = dma.hbm_to_vmem [thread:$0]  %s105_s4, 512, %s107_s22, [#allocation9], %s1146_s29, %s1146_s29, %s1147_s6  }
  0x21   :  { %1133 = dma.done.wait [#allocation3], 256  }
  0x22   :  { %1134 = vsyncadd [#allocation3], 4294967040 }
  0x23   :  { %1135 = dma.done.wait [#allocation6], 32  }
  0x24   :  { %1136 = vsyncadd [#allocation6], 4294967264 }
  0x25   :  { %1137 = dma.done.wait [#allocation9], 528  }
  0x26   :  { %1138 = vsyncadd [#allocation9], 4294966768  ;;  %s1567_s1 = sld [smem:[#allocation20_spill]]  ;;  %vm145_vm0 = vcmask 261120   ;;  %v140_v4 = vld [vmem:[#allocation2 + $0x8] sm:$0xff]  ;;  %v139_v5 = vld [vmem:[#allocation2] sm:$0xff] }
  0x27   :  { %s1568_s28 = sld [smem:[#allocation23_spill]]  ;;  %v916_v49 = vld [vmem:[#allocation5] ss:$0 sm:$0xff]  ;;  %s1150_s24 = smov [#allocation11]  }
  0x28   :  { %s1569_s15 = sld [smem:[#allocation21_spill]]  ;;  %s818_s2 = sshll.u32 %s1150_s24, 4  ;;  %s819_s2 = int_to_ptr.vmem [resolvable:$true] %s818_s2 }
  0x29   :  { %s820_s26 = sshll.u32 %s1550_s19, 4  ;;  %s1570_s22 = sld [smem:[#allocation25_spill]]  ;;  %s821_s26 = int_to_ptr.hbm [resolvable:$true] %s820_s26 }
  0x2a   :  { %s1571_s23 = sld [smem:[#allocation26_spill]] }
  0x2c   :  { %v144_v0 = vld [vmem:[%s1567_s1 + $0x18] sm:$0xff]  ;;  %v143_v1 = vld [vmem:[%s1567_s1 + $0x10] sm:$0xff]  ;;  %v142_v2 = vld [vmem:[%s1567_s1 + $0x8] sm:$0xff] }
  0x2d   :  { %898 = vmatpush.msra.mxu2 %v144_v0  ;;  %164 = vmatpush.msra.mxu0 %v144_v0  ;;  %v141_v3 = vld [vmem:[%s1567_s1] sm:$0xff]  ;;  %v231_v23 = vld [vmem:[%s1568_s28 + $0x18] sm:$0xff]  ;;  %v230_v24 = vld [vmem:[%s1568_s28 + $0x10] sm:$0xff] }
  0x2e   :  { %250 = vmatpush.msra.mxu1 %v231_v23  ;;  %902 = vmatpush.msra.mxu3 %v231_v23  ;;  %v229_v27 = vld [vmem:[%s1568_s28 + $0x8] sm:$0xff]  ;;  %v228_v30 = vld [vmem:[%s1568_s28] sm:$0xff] }
  0x2f   :  { %899 = vmatpush.msra.mxu2 %v143_v1  ;;  %165 = vmatpush.msra.mxu0 %v143_v1  ;;  %v915_v45 = vld [vmem:[%s1569_s15] ss:$0 sm:$0xff]  ;;  %s833_s21 = sshll.u32 %s1570_s22, 4  ;;  %s834_s21 = int_to_ptr.hbm [resolvable:$true] %s833_s21 }
  0x30   :  { %251 = vmatpush.msra.mxu1 %v230_v24  ;;  %903 = vmatpush.msra.mxu3 %v230_v24 }
  0x31   :  { %900 = vmatpush.msra.mxu2 %v142_v2  ;;  %166 = vmatpush.msra.mxu0 %v142_v2 }
  0x32   :  { %252 = vmatpush.msra.mxu1 %v229_v27  ;;  %904 = vmatpush.msra.mxu3 %v229_v27 }
  0x33   :  { %901 = vmatpush.msra.mxu2 %v141_v3  ;;  %167 = vmatpush.msra.mxu0 %v141_v3 }
  0x34   :  { %858 = vmatmul.msk.f32.vlgmr.msra.gmra.mxu2 %vm145_vm0, %v140_v4  ;;  %857 = vmatmul.msk.f32.vlgmr.msra.gmra.mxu0 %vm145_vm0, %v139_v5 }
  0x35   :  { %253 = vmatpush.msra.mxu1 %v228_v30  ;;  %905 = vmatpush.msra.mxu3 %v228_v30  ;;  %v917_v30 = vld [vmem:[#allocation7] ss:$0 sm:$0xff] }
  0xb1   :  { %v169_v6 = vpop.f32.mrf.mxu0 }
  0xb2   :  { %v184_v7 = vmul.f32 %v169_v6, %v169_v6  ;;  %v175_v8 = vsel %vm145_vm0, %v169_v6, 0.0 }
  0xb4   :  { %v186_v10 = vsel %vm145_vm0, %v184_v7, 0.0 }
  0xb7   :  { %v172_v9 = vpop.f32.mrf.mxu2 }
  0xb8   :  { %v176_v11 = vsel %vm145_vm0, %v172_v9, 0.0  ;;  %v185_v12 = vmul.f32 %v172_v9, %v172_v9 }
  0xb9   :  { %v177_v13 = vadd.f32 %v176_v11, %v175_v8 }
  0xba   :  { %v187_v14 = vsel %vm145_vm0, %v185_v12, 0.0  ;;  %v316_v12 = vld [vmem:[%s1538_s7 + $0x10] sm:$0xff] }
  0xbb   :  { %v178_v15 = vrot.slane %v177_v13, 4  ;;  %v188_v16 = vadd.f32 %v187_v14, %v186_v10 }
  0xbd   :  { %v179_v17 = vadd.f32 %v178_v15, %v177_v13  ;;  %v189_v18 = vrot.slane %v188_v16, 4  ;;  %v315_v13 = vld [vmem:[%s1538_s7 + $0x8] sm:$0xff] }
  0xbf   :  { %v180_v19 = vrot.slane %v179_v17, 2  ;;  %v190_v20 = vadd.f32 %v189_v18, %v188_v16  ;;  %v314_v16 = vld [vmem:[%s1538_s7] sm:$0xff] }
  0xc1   :  { %v181_v21 = vadd.f32 %v180_v19, %v179_v17  ;;  %v191_v22 = vrot.slane %v190_v20, 2 }
  0xc3   :  { %v182_v25 = vrot.slane %v181_v21, 1  ;;  %v192_v26 = vadd.f32 %v191_v22, %v190_v20 }
  0xc5   :  { %v183_v28 = vadd.f32 %v182_v25, %v181_v21  ;;  %v193_v29 = vrot.slane %v192_v26, 1 }
  0xc7   :  { %v194_v31 = vadd.f32 %v193_v29, %v192_v26  ;;  %v195_v32 = vmul.f32 0.0625, %v183_v28 }
  0xc9   :  { %v196_v33 = vmul.f32 0.0625, %v194_v31  ;;  %v197_v34 = vmul.f32 %v195_v32, %v195_v32  ;;  %v199_v43 = vsub.f32 %v169_v6, %v195_v32  ;;  %v200_v44 = vsub.f32 %v172_v9, %v195_v32  ;;  %v317_v9 = vld [vmem:[%s1538_s7 + $0x18] sm:$0xff] }
  0xca   :  { %336 = vmatpush.msrb.mxu2 %v317_v9 }
  0xcb   :  { %v198_v35 = vsub.f32 %v196_v33, %v197_v34  ;;  %v918_v34 = vld [vmem:[#allocation8] ss:$0 sm:$0xff] }
  0xcc   :  { %337 = vmatpush.msrb.mxu2 %v316_v12 }
  0xcd   :  { %v201_v36 = vadd.f32 1e-05, %v198_v35 }
  0xce   :  { %338 = vmatpush.msrb.mxu2 %v315_v13 }
  0xcf   :  { %929 = vrsqrt.f32 %v201_v36  ;;  %vm208_vm2 = vweird.f32 %v201_v36 }
  0xd0   :  { %339 = vmatpush.msrb.mxu2 %v314_v16  ;;  %v919_v16 = vld [vmem:[%s1539_s8] ss:$0 sm:$0xff] }
  0xd5   :  { %v930_v37 = vpop.eup %929 }
  0xd6   :  { %v203_v38 = vmul.f32 %v930_v37, %v201_v36  ;;  %vm209_vm1 = vweird.f32 %v930_v37 }
  0xd7   :  { %vm210_vm3 = vmor %vm208_vm2, %vm209_vm1 }
  0xd8   :  { %v204_v39 = vmul.f32 %v930_v37, %v203_v38 }
  0xda   :  { %v205_v40 = vmul.f32 0.5, %v204_v39 }
  0xdc   :  { %v206_v41 = vsub.f32 1.5, %v205_v40 }
  0xde   :  { %v207_v42 = vmul.f32 %v930_v37, %v206_v41 }
  0xe0   :  { %v211_v46 = vsel %vm210_vm3, %v930_v37, %v207_v42 }
  0xe1   :  { %v212_v47 = vmul.f32 %v211_v46, %v199_v43  ;;  %v213_v48 = vmul.f32 %v211_v46, %v200_v44 }
  0xe3   :  { %v218_v50 = vmul.f32 %v915_v45, %v212_v47  ;;  %v219_v51 = vmul.f32 %v915_v45, %v213_v48 }
  0xe5   :  { %v224_v52 = vadd.f32 %v916_v49, %v218_v50  ;;  %v225_v53 = vadd.f32 %v916_v49, %v219_v51 }
  0xe7   :  { %v226_v54 = vmax.f32 %v224_v52, 0.0  ;;  %v227_v55 = vmax.f32 %v225_v53, 0.0 }
  0xe9   :  { %859 = vmatmul.msk.f32.vlgmr.msra.gmra.mxu1 %vm145_vm0, %v226_v54  ;;  %860 = vmatmul.msk.f32.vlgmr.msra.gmra.mxu3 %vm145_vm0, %v227_v55 }
 0x166   :  { %v255_v56 = vpop.f32.mrf.mxu1 }
 0x167   :  { %v270_v57 = vmul.f32 %v255_v56, %v255_v56  ;;  %v261_v59 = vsel %vm145_vm0, %v255_v56, 0.0 }
 0x169   :  { %v272_v63 = vsel %vm145_vm0, %v270_v57, 0.0 }
 0x16c   :  { %v258_v58 = vpop.f32.mrf.mxu3 }
 0x16d   :  { %v262_v60 = vsel %vm145_vm0, %v258_v58, 0.0  ;;  %v271_v61 = vmul.f32 %v258_v58, %v258_v58 }
 0x16e   :  { %v263_v62 = vadd.f32 %v262_v60, %v261_v59  ;;  %v403_v59 = vld [vmem:[%s1541_s10 + $0x18] sm:$0xff] }
 0x16f   :  { %v273_v0 = vsel %vm145_vm0, %v271_v61, 0.0  ;;  %422 = vmatpush.msrb.mxu3 %v403_v59  ;;  %v599_v59 = vld [vmem:[%s1548_s17 + $0x8] sm:$0xff] }
 0x170   :  { %v264_v1 = vrot.slane %v263_v62, 4  ;;  %v274_v2 = vadd.f32 %v273_v0, %v272_v63  ;;  %v401_v63 = vld [vmem:[%s1541_s10 + $0x8] sm:$0xff] }
 0x172   :  { %v265_v3 = vadd.f32 %v264_v1, %v263_v62  ;;  %v275_v4 = vrot.slane %v274_v2, 4  ;;  %v402_v62 = vld [vmem:[%s1541_s10 + $0x10] sm:$0xff] }
 0x173   :  { %423 = vmatpush.msrb.mxu3 %v402_v62 }
 0x174   :  { %v266_v5 = vrot.slane %v265_v3, 2  ;;  %v276_v6 = vadd.f32 %v275_v4, %v274_v2  ;;  %v400_v2 = vld [vmem:[%s1541_s10] sm:$0xff] }
 0x175   :  { %424 = vmatpush.msrb.mxu3 %v401_v63  ;;  %v486_v63 = vld [vmem:[%s1544_s13] sm:$0xff] }
 0x176   :  { %v267_v7 = vadd.f32 %v266_v5, %v265_v3  ;;  %v277_v8 = vrot.slane %v276_v6, 2 }
 0x177   :  { %425 = vmatpush.msrb.mxu3 %v400_v2  ;;  %v871_v2 = vld [vmem:[%s1548_s17 + $0x20] sm:$0xff] }
 0x178   :  { %v268_v10 = vrot.slane %v267_v7, 1  ;;  %v278_v11 = vadd.f32 %v277_v8, %v276_v6 }
 0x17a   :  { %v269_v14 = vadd.f32 %v268_v10, %v267_v7  ;;  %v279_v15 = vrot.slane %v278_v11, 1 }
 0x17c   :  { %v280_v17 = vadd.f32 %v279_v15, %v278_v11  ;;  %v281_v18 = vmul.f32 0.0625, %v269_v14 }
 0x17e   :  { %v282_v19 = vmul.f32 0.0625, %v280_v17  ;;  %v283_v20 = vmul.f32 %v281_v18, %v281_v18  ;;  %v285_v29 = vsub.f32 %v255_v56, %v281_v18  ;;  %v286_v32 = vsub.f32 %v258_v58, %v281_v18 }
 0x180   :  { %v284_v21 = vsub.f32 %v282_v19, %v283_v20  ;;  %v920_v20 = vld [vmem:[%s1540_s9] ss:$0 sm:$0xff] }
 0x182   :  { %v287_v22 = vadd.f32 1e-05, %v284_v21 }
 0x184   :  { %931 = vrsqrt.f32 %v287_v22  ;;  %vm294_vm5 = vweird.f32 %v287_v22 }
 0x18a   :  { %v932_v23 = vpop.eup %931 }
 0x18b   :  { %v289_v24 = vmul.f32 %v932_v23, %v287_v22  ;;  %vm295_vm4 = vweird.f32 %v932_v23 }
 0x18c   :  { %vm296_vm6 = vmor %vm294_vm5, %vm295_vm4 }
 0x18d   :  { %v290_v25 = vmul.f32 %v932_v23, %v289_v24 }
 0x18f   :  { %v291_v26 = vmul.f32 0.5, %v290_v25 }
 0x191   :  { %v292_v27 = vsub.f32 1.5, %v291_v26 }
 0x193   :  { %v293_v28 = vmul.f32 %v932_v23, %v292_v27 }
 0x195   :  { %v297_v31 = vsel %vm296_vm6, %v932_v23, %v293_v28 }
 0x196   :  { %v298_v33 = vmul.f32 %v297_v31, %v285_v29  ;;  %v299_v35 = vmul.f32 %v297_v31, %v286_v32 }
 0x198   :  { %v304_v36 = vmul.f32 %v917_v30, %v298_v33  ;;  %v305_v39 = vmul.f32 %v917_v30, %v299_v35 }
 0x19a   :  { %v310_v37 = vadd.f32 %v918_v34, %v304_v36  ;;  %v311_v40 = vadd.f32 %v918_v34, %v305_v39 }
 0x19c   :  { %v312_v38 = vmax.f32 %v310_v37, 0.0  ;;  %v313_v41 = vmax.f32 %v311_v40, 0.0 }
 0x19e   :  { %861 = vmatmul.msk.f32.vlgmr.msrb.gmra.mxu2 %vm145_vm0, %v312_v38 }
 0x1a6   :  { %862 = vmatmul.msk.f32.gmra.mxu2 %vm145_vm0, %v313_v41 }
 0x221   :  { %v341_v42 = vpop.f32.mrf.mxu2 }
 0x222   :  { %v356_v43 = vmul.f32 %v341_v42, %v341_v42  ;;  %v347_v45 = vsel %vm145_vm0, %v341_v42, 0.0 }
 0x224   :  { %v358_v49 = vsel %vm145_vm0, %v356_v43, 0.0 }
 0x229   :  { %v344_v44 = vpop.f32.mrf.mxu2 }
 0x22a   :  { %v348_v46 = vsel %vm145_vm0, %v344_v44, 0.0  ;;  %v357_v47 = vmul.f32 %v344_v44, %v344_v44 }
 0x22b   :  { %v349_v48 = vadd.f32 %v348_v46, %v347_v45  ;;  %v489_v45 = vld [vmem:[%s1544_s13 + $0x18] sm:$0xff] }
 0x22c   :  { %v359_v50 = vsel %vm145_vm0, %v357_v47, 0.0  ;;  %v601_v46 = vld [vmem:[%s1548_s17 + $0x18] sm:$0xff]  ;;  %512 = vmatpush.msrb.mxu0 %v489_v45 }
 0x22d   :  { %v350_v51 = vrot.slane %v349_v48, 4  ;;  %v360_v52 = vadd.f32 %v359_v50, %v358_v49  ;;  %618 = vmatpush.msra.mxu2 %v601_v46  ;;  %v874_v47 = vld [vmem:[%s1548_s17 + $0x38] sm:$0xff]  ;;  %v925_v46 = vld [vmem:[%s1549_s18] ss:$0 sm:$0xff] }
 0x22e   :  { %651 = vmatpush.msra.mxu3 %v874_v47  ;;  %v926_v47 = vld [vmem:[%s1549_s18 + $0x1] ss:$0 sm:$0xff] }
 0x22f   :  { %v351_v53 = vadd.f32 %v350_v51, %v349_v48  ;;  %v361_v54 = vrot.slane %v360_v52, 4  ;;  %v528_v48 = vld [vmem:[#allocation10 + $0x18] sm:$0xff] }
 0x230   :  { %545 = vmatpush.msrb.mxu1 %v528_v48  ;;  %v488_v51 = vld [vmem:[%s1544_s13 + $0x10] sm:$0xff] }
 0x231   :  { %v352_v55 = vrot.slane %v351_v53, 2  ;;  %v362_v56 = vadd.f32 %v361_v54, %v360_v52  ;;  %v527_v52 = vld [vmem:[#allocation10 + $0x10] sm:$0xff]  ;;  %513 = vmatpush.msrb.mxu0 %v488_v51  ;;  %v873_v54 = vld [vmem:[%s1548_s17 + $0x30] sm:$0xff] }
 0x232   :  { %546 = vmatpush.msrb.mxu1 %v527_v52  ;;  %652 = vmatpush.msra.mxu3 %v873_v54 }
 0x233   :  { %v353_v57 = vadd.f32 %v352_v55, %v351_v53  ;;  %v363_v58 = vrot.slane %v362_v56, 2  ;;  %v600_v53 = vld [vmem:[%s1548_s17 + $0x10] sm:$0xff] }
 0x234   :  { %619 = vmatpush.msra.mxu2 %v600_v53 }
 0x235   :  { %v354_v60 = vrot.slane %v353_v57, 1  ;;  %v364_v61 = vadd.f32 %v363_v58, %v362_v56  ;;  %v526_v58 = vld [vmem:[#allocation10 + $0x8] sm:$0xff] }
 0x236   :  { %547 = vmatpush.msrb.mxu1 %v526_v58  ;;  %620 = vmatpush.msra.mxu2 %v599_v59 }
 0x237   :  { %v355_v0 = vadd.f32 %v354_v60, %v353_v57  ;;  %v365_v1 = vrot.slane %v364_v61, 1  ;;  %v487_v57 = vld [vmem:[%s1544_s13 + $0x8] sm:$0xff] }
 0x238   :  { %514 = vmatpush.msrb.mxu0 %v487_v57  ;;  %v872_v60 = vld [vmem:[%s1548_s17 + $0x28] sm:$0xff]  ;;  %v928_v57 = vld [vmem:[%s1549_s18 + $0x3] ss:$0 sm:$0xff] }
 0x239   :  { %v366_v3 = vadd.f32 %v365_v1, %v364_v61  ;;  %v367_v4 = vmul.f32 0.0625, %v355_v0  ;;  %v525_v0 = vld [vmem:[#allocation10] sm:$0xff]  ;;  %v598_v1 = vld [vmem:[%s1548_s17] sm:$0xff]  ;;  %653 = vmatpush.msra.mxu3 %v872_v60 }
 0x23a   :  { %515 = vmatpush.msrb.mxu0 %v486_v63  ;;  %548 = vmatpush.msrb.mxu1 %v525_v0 }
 0x23b   :  { %v368_v5 = vmul.f32 0.0625, %v366_v3  ;;  %v369_v6 = vmul.f32 %v367_v4, %v367_v4  ;;  %v371_v15 = vsub.f32 %v341_v42, %v367_v4  ;;  %v372_v18 = vsub.f32 %v344_v44, %v367_v4  ;;  %621 = vmatpush.msra.mxu2 %v598_v1  ;;  %654 = vmatpush.msra.mxu3 %v871_v2 }
 0x23d   :  { %v370_v7 = vsub.f32 %v368_v5, %v369_v6  ;;  %v881_v5 = vld [vmem:[%s1548_s17 + $0x58] sm:$0xff] }
 0x23e   :  { %v888_v6 = vld [vmem:[%s1548_s17 + $0x78] sm:$0xff]  ;;  %684 = vmatpush.msra.mxu0 %v881_v5 }
 0x23f   :  { %v373_v8 = vadd.f32 1e-05, %v370_v7  ;;  %v880_v7 = vld [vmem:[%s1548_s17 + $0x50] sm:$0xff]  ;;  %717 = vmatpush.msra.mxu1 %v888_v6 }
 0x240   :  { %685 = vmatpush.msra.mxu0 %v880_v7 }
 0x241   :  { %933 = vrsqrt.f32 %v373_v8  ;;  %vm380_vm8 = vweird.f32 %v373_v8 }
 0x247   :  { %v934_v9 = vpop.eup %933 }
 0x248   :  { %v375_v10 = vmul.f32 %v934_v9, %v373_v8  ;;  %vm381_vm7 = vweird.f32 %v934_v9 }
 0x249   :  { %vm382_vm9 = vmor %vm380_vm8, %vm381_vm7 }
 0x24a   :  { %v376_v11 = vmul.f32 %v934_v9, %v375_v10 }
 0x24c   :  { %v377_v12 = vmul.f32 0.5, %v376_v11  ;;  %v879_v11 = vld [vmem:[%s1548_s17 + $0x48] sm:$0xff] }
 0x24d   :  { %686 = vmatpush.msra.mxu0 %v879_v11 }
 0x24e   :  { %v378_v13 = vsub.f32 1.5, %v377_v12  ;;  %v886_v12 = vld [vmem:[%s1548_s17 + $0x68] sm:$0xff] }
 0x250   :  { %v379_v14 = vmul.f32 %v934_v9, %v378_v13  ;;  %v878_v13 = vld [vmem:[%s1548_s17 + $0x40] sm:$0xff] }
 0x251   :  { %687 = vmatpush.msra.mxu0 %v878_v13 }
 0x252   :  { %v383_v17 = vsel %vm382_vm9, %v934_v9, %v379_v14  ;;  %v887_v9 = vld [vmem:[%s1548_s17 + $0x70] sm:$0xff]  ;;  %v885_v14 = vld [vmem:[%s1548_s17 + $0x60] sm:$0xff]  ;;  %vm796_vm9 = vcmask 64512  }
 0x253   :  { %v384_v19 = vmul.f32 %v383_v17, %v371_v15  ;;  %v385_v21 = vmul.f32 %v383_v17, %v372_v18  ;;  %718 = vmatpush.msra.mxu1 %v887_v9 }
 0x255   :  { %v390_v22 = vmul.f32 %v919_v16, %v384_v19  ;;  %v391_v25 = vmul.f32 %v919_v16, %v385_v21  ;;  %719 = vmatpush.msra.mxu1 %v886_v12 }
 0x257   :  { %v396_v23 = vadd.f32 %v920_v20, %v390_v22  ;;  %v397_v26 = vadd.f32 %v920_v20, %v391_v25  ;;  %720 = vmatpush.msra.mxu1 %v885_v14  ;;  %v921_v22 = vld [vmem:[%s1542_s11] ss:$0 sm:$0xff] }
 0x259   :  { %v398_v24 = vmax.f32 %v396_v23, 0.0  ;;  %v399_v27 = vmax.f32 %v397_v26, 0.0  ;;  %v922_v26 = vld [vmem:[%s1543_s12] ss:$0 sm:$0xff] }
 0x25b   :  { %863 = vmatmul.msk.f32.vlgmr.msrb.gmra.mxu3 %vm145_vm0, %v398_v24 }
 0x263   :  { %864 = vmatmul.msk.f32.gmra.mxu3 %vm145_vm0, %v399_v27 }
 0x2de   :  { %v1360_v28 = vpop.f32.mrf.mxu3 }
 0x2df   :  { %v442_v29 = vmul.f32 %v1360_v28, %v1360_v28  ;;  %v433_v31 = vsel %vm145_vm0, %v1360_v28, 0.0 }
 0x2e1   :  { %v444_v35 = vsel %vm145_vm0, %v442_v29, 0.0 }
 0x2e6   :  { %v1364_v30 = vpop.f32.mrf.mxu3 }
 0x2e7   :  { %v434_v32 = vsel %vm145_vm0, %v1364_v30, 0.0  ;;  %v443_v33 = vmul.f32 %v1364_v30, %v1364_v30 }
 0x2e8   :  { %v435_v34 = vadd.f32 %v434_v32, %v433_v31 }
 0x2e9   :  { %v445_v36 = vsel %vm145_vm0, %v443_v33, 0.0 }
 0x2ea   :  { %v436_v37 = vrot.slane %v435_v34, 4  ;;  %v446_v38 = vadd.f32 %v445_v36, %v444_v35  ;;  %v924_v35 = vld [vmem:[%s1547_s16] ss:$0 sm:$0xff] }
 0x2ec   :  { %v437_v39 = vadd.f32 %v436_v37, %v435_v34  ;;  %v447_v40 = vrot.slane %v446_v38, 4  ;;  %v923_v34 = vld [vmem:[%s1545_s14] ss:$0 sm:$0xff] }
 0x2ee   :  { %v438_v41 = vrot.slane %v437_v39, 2  ;;  %v448_v42 = vadd.f32 %v447_v40, %v446_v38 }
 0x2f0   :  { %v439_v43 = vadd.f32 %v438_v41, %v437_v39  ;;  %v449_v44 = vrot.slane %v448_v42, 2 }
 0x2f2   :  { %v440_v49 = vrot.slane %v439_v43, 1  ;;  %v450_v50 = vadd.f32 %v449_v44, %v448_v42 }
 0x2f4   :  { %v441_v55 = vadd.f32 %v440_v49, %v439_v43  ;;  %v451_v56 = vrot.slane %v450_v50, 1 }
 0x2f6   :  { %v452_v61 = vadd.f32 %v451_v56, %v450_v50  ;;  %v453_v62 = vmul.f32 0.0625, %v441_v55  ;;  %v927_v55 = vld [vmem:[%s1549_s18 + $0x2] ss:$0 sm:$0xff]  ;;  %s1151_s18 = smov [#allocation12]  }
 0x2f7   :  { %s831_s30 = sshll.u32 %s1151_s18, 4  ;;  %s832_s30 = int_to_ptr.vmem [resolvable:$true] %s831_s30 }
 0x2f8   :  { %v454_v3 = vmul.f32 0.0625, %v452_v61  ;;  %v455_v4 = vmul.f32 %v453_v62, %v453_v62  ;;  %v457_v21 = vsub.f32 %v1360_v28, %v453_v62  ;;  %v458_v24 = vsub.f32 %v1364_v30, %v453_v62 }
 0x2fa   :  { %v456_v8 = vsub.f32 %v454_v3, %v455_v4 }
 0x2fc   :  { %v459_v10 = vadd.f32 1e-05, %v456_v8 }
 0x2fe   :  { %935 = vrsqrt.f32 %v459_v10  ;;  %vm466_vm11 = vweird.f32 %v459_v10 }
 0x304   :  { %v936_v15 = vpop.eup %935 }
 0x305   :  { %v461_v16 = vmul.f32 %v936_v15, %v459_v10  ;;  %vm467_vm10 = vweird.f32 %v936_v15 }
 0x306   :  { %vm468_vm12 = vmor %vm466_vm11, %vm467_vm10 }
 0x307   :  { %v462_v17 = vmul.f32 %v936_v15, %v461_v16 }
 0x309   :  { %v463_v18 = vmul.f32 0.5, %v462_v17 }
 0x30b   :  { %v464_v19 = vsub.f32 1.5, %v463_v18 }
 0x30d   :  { %v465_v20 = vmul.f32 %v936_v15, %v464_v19 }
 0x30f   :  { %v469_v23 = vsel %vm468_vm12, %v936_v15, %v465_v20 }
 0x310   :  { %v470_v25 = vmul.f32 %v469_v23, %v457_v21  ;;  %v471_v27 = vmul.f32 %v469_v23, %v458_v24 }
 0x312   :  { %v476_v29 = vmul.f32 %v921_v22, %v470_v25  ;;  %v477_v32 = vmul.f32 %v921_v22, %v471_v27 }
 0x314   :  { %v482_v31 = vadd.f32 %v922_v26, %v476_v29  ;;  %v483_v28 = vadd.f32 %v922_v26, %v477_v32 }
 0x316   :  { %v484_v33 = vmax.f32 %v482_v31, 0.0  ;;  %v485_v30 = vmax.f32 %v483_v28, 0.0 }
 0x318   :  { %865 = vmatmul.msk.f32.vlgmr.msrb.gmra.mxu0 %vm145_vm0, %v484_v33  ;;  %867 = vmatmul.msk.f32.vlgmr.msrb.gmra.mxu1 %vm145_vm0, %v484_v33 }
 0x319   :  { %869 = vmatmul.msk.f32.vlgmr.msra.gmra.mxu2 %vm145_vm0, %v484_v33  ;;  %876 = vmatmul.msk.f32.vlgmr.msra.gmra.mxu3 %vm145_vm0, %v484_v33 }
 0x320   :  { %866 = vmatmul.msk.f32.gmra.mxu0 %vm145_vm0, %v485_v30  ;;  %868 = vmatmul.msk.f32.gmra.mxu1 %vm145_vm0, %v485_v30 }
 0x321   :  { %870 = vmatmul.msk.f32.gmra.mxu2 %vm145_vm0, %v485_v30  ;;  %877 = vmatmul.msk.f32.gmra.mxu3 %vm145_vm0, %v485_v30 }
 0x328   :  { %883 = vmatmul.msk.f32.vlgmr.msra.gmra.mxu0 %vm145_vm0, %v484_v33  ;;  %890 = vmatmul.msk.f32.vlgmr.msra.gmra.mxu1 %vm145_vm0, %v484_v33 }
 0x330   :  { %884 = vmatmul.msk.f32.gmra.mxu0 %vm145_vm0, %v485_v30  ;;  %891 = vmatmul.msk.f32.gmra.mxu1 %vm145_vm0, %v485_v30 }
 0x395   :  { %v517_v36 = vpop.f32.mrf.mxu0  ;;  %v550_v37 = vpop.f32.mrf.mxu1 }
 0x396   :  { %v518_v38 = vadd.f32 %v923_v34, %v517_v36  ;;  %v551_v39 = vadd.f32 %v924_v35, %v550_v37 }
 0x398   :  { %523 = vst.msk [vmem:[#allocation11] sm:$0xff] %vm145_vm0, %v518_v38  ;;  %v556_v40 = vsub.f32 0.0, %v551_v39 }
 0x39a   :  { %v558_v41 = vmul.f32 1.442695, %v556_v40 }
 0x39c   :  { %937 = vpow2.f32 %v558_v41  ;;  %v623_v42 = vpop.f32.mrf.mxu2  ;;  %v656_v43 = vpop.f32.mrf.mxu3 }
 0x39d   :  { %v520_v44 = vpop.f32.mrf.mxu0  ;;  %v553_v45 = vpop.f32.mrf.mxu1  ;;  %v624_v52 = vadd.f32 %v925_v46, %v623_v42  ;;  %v657_v53 = vadd.f32 %v926_v47, %v656_v43 }
 0x39e   :  { %v521_v48 = vadd.f32 %v923_v34, %v520_v44  ;;  %v554_v49 = vadd.f32 %v924_v35, %v553_v45 }
 0x39f   :  { %v728_v60 = vmax.f32 %v624_v52, %v657_v53 }
 0x3a0   :  { %524 = vst.msk [vmem:[#allocation11 + $0x8] sm:$0xff] %vm145_vm0, %v521_v48  ;;  %v557_v50 = vsub.f32 0.0, %v554_v49 }
 0x3a1   :  { %826 = dma.vmem_to_hbm [thread:$0]  %s819_s2, 256, %s821_s26, [#allocation4], %s1146_s29, %s1146_s29, %s1147_s6  }
 0x3a2   :  { %v938_v51 = vpop.eup %937  ;;  %v560_v54 = vmul.f32 1.442695, %v557_v50 }
 0x3a3   :  { %v562_v56 = vadd.f32 1.0, %v938_v51 }
 0x3a4   :  { %939 = vpow2.f32 %v560_v54  ;;  %v626_v61 = vpop.f32.mrf.mxu2  ;;  %v659_v62 = vpop.f32.mrf.mxu3 }
 0x3a5   :  { %941 = vrcp.f32 %v562_v56  ;;  %v689_v58 = vpop.f32.mrf.mxu0  ;;  %v722_v59 = vpop.f32.mrf.mxu1  ;;  %v627_v2 = vadd.f32 %v925_v46, %v626_v61  ;;  %v660_v3 = vadd.f32 %v926_v47, %v659_v62  ;;  %v575_v21 = vand.u32 2147483648, %v562_v56 }
 0x3a6   :  { %v690_v63 = vadd.f32 %v927_v55, %v689_v58  ;;  %v723_v1 = vadd.f32 %v928_v57, %v722_v59  ;;  %v573_v26 = vand.u32 2147483647, %v562_v56  ;;  %vm569_vm14 = vweird.f32 %v562_v56 }
 0x3a7   :  { %v729_v12 = vmax.f32 %v627_v2, %v660_v3  ;;  %v576_v32 = vor.u32 1.1754944e-38, %v575_v21 }
 0x3a8   :  { %v730_v0 = vmax.f32 %v728_v60, %v690_v63  ;;  %vm574_vm1 = vcmp.eq.f32.partialorder %v573_v26, 8.507059e+37 }
 0x3aa   :  { %v940_v4 = vpop.eup %939  ;;  %v732_v5 = vmax.f32 %v730_v0, %v723_v1 }
 0x3ab   :  { %v942_v6 = vpop.eup %941  ;;  %v1480_v7 = vadd.f32 1.0, %v940_v4 }
 0x3ac   :  { %v565_v8 = vmul.f32 %v942_v6, %v562_v56  ;;  %v734_v9 = vsub.f32 %v624_v52, %v732_v5  ;;  %v740_v10 = vsub.f32 %v657_v53, %v732_v5  ;;  %v746_v11 = vsub.f32 %v690_v63, %v732_v5 }
 0x3ad   :  { %943 = vrcp.f32 %v1480_v7  ;;  %v752_v13 = vsub.f32 %v723_v1, %v732_v5  ;;  %v692_v14 = vpop.f32.mrf.mxu0  ;;  %v725_v15 = vpop.f32.mrf.mxu1  ;;  %vm570_vm13 = vweird.f32 %v942_v6  ;;  %v588_v45 = vand.u32 2147483647, %v1480_v7 }
 0x3ae   :  { %v566_v16 = vsub.f32 1.0, %v565_v8  ;;  %v736_v17 = vmul.f32 1.442695, %v734_v9  ;;  %v742_v18 = vmul.f32 1.442695, %v740_v10  ;;  %v693_v19 = vadd.f32 %v927_v55, %v692_v14  ;;  %vm571_vm15 = vmor %vm569_vm14, %vm570_vm13 }
 0x3af   :  { %v748_v20 = vmul.f32 1.442695, %v746_v11  ;;  %v726_v24 = vadd.f32 %v928_v57, %v725_v15  ;;  %v754_v25 = vmul.f32 1.442695, %v752_v13  ;;  %v590_v46 = vand.u32 2147483648, %v1480_v7 }
 0x3b0   :  { %v567_v22 = vmul.f32 %v942_v6, %v566_v16  ;;  %945 = vpow2.f32 %v736_v17  ;;  %v731_v23 = vmax.f32 %v729_v12, %v693_v19  ;;  %vm584_vm3 = vweird.f32 %v1480_v7 }
 0x3b1   :  { %947 = vpow2.f32 %v742_v18  ;;  %v591_v55 = vor.u32 1.1754944e-38, %v590_v46  ;;  %vm589_vm5 = vcmp.eq.f32.partialorder %v588_v45, 8.507059e+37 }
 0x3b2   :  { %v733_v27 = vmax.f32 %v731_v23, %v726_v24  ;;  %v568_v29 = vadd.f32 %v942_v6, %v567_v22  ;;  %949 = vpow2.f32 %v748_v20 }
 0x3b3   :  { %v944_v31 = vpop.eup %943  ;;  %951 = vpow2.f32 %v754_v25 }
 0x3b4   :  { %v580_v33 = vmul.f32 %v944_v31, %v1480_v7  ;;  %v735_v28 = vsub.f32 %v627_v2, %v733_v27  ;;  %v741_v30 = vsub.f32 %v660_v3, %v733_v27  ;;  %v747_v34 = vsub.f32 %v693_v19, %v733_v27 }
 0x3b5   :  { %v753_v35 = vsub.f32 %v726_v24, %v733_v27  ;;  %v572_v36 = vsel %vm571_vm15, %v942_v6, %v568_v29  ;;  %vm585_vm2 = vweird.f32 %v944_v31 }
 0x3b6   :  { %v1484_v37 = vpop.eup %945  ;;  %v581_v38 = vsub.f32 1.0, %v580_v33  ;;  %v738_v39 = vmul.f32 1.442695, %v735_v28  ;;  %v744_v40 = vmul.f32 1.442695, %v741_v30  ;;  %v577_v41 = vsel %vm574_vm1, %v576_v32, %v572_v36  ;;  %vm586_vm4 = vmor %vm584_vm3, %vm585_vm2 }
 0x3b7   :  { %v948_v42 = vpop.eup %947  ;;  %v750_v43 = vmul.f32 1.442695, %v747_v34  ;;  %v578_v44 = vmul.f32 2.0, %v577_v41  ;;  %v756_v50 = vmul.f32 1.442695, %v753_v35 }
 0x3b8   :  { %v582_v47 = vmul.f32 %v944_v31, %v581_v38  ;;  %v758_v48 = vadd.f32 %v948_v42, %v1484_v37  ;;  %953 = vpow2.f32 %v738_v39  ;;  %v950_v49 = vpop.eup %949 }
 0x3b9   :  { %955 = vpow2.f32 %v744_v40  ;;  %v594_v51 = vadd.f32 0.1, %v578_v44  ;;  %v952_v54 = vpop.eup %951 }
 0x3ba   :  { %v760_v52 = vadd.f32 %v950_v49, %v758_v48  ;;  %v583_v53 = vadd.f32 %v944_v31, %v582_v47  ;;  %957 = vpow2.f32 %v750_v43 }
 0x3bb   :  { %596 = vst.msk [vmem:[#allocation12] sm:$0xff] %vm145_vm0, %v594_v51  ;;  %959 = vpow2.f32 %v756_v50 }
 0x3bc   :  { %v762_v56 = vadd.f32 %v952_v54, %v760_v52  ;;  %v587_v57 = vsel %vm586_vm4, %v944_v31, %v583_v53 }
 0x3bd   :  { %v592_v58 = vsel %vm589_vm5, %v591_v55, %v587_v57 }
 0x3be   :  { %v954_v59 = vpop.eup %953  ;;  %961 = vrcp.f32 %v762_v56  ;;  %v593_v61 = vmul.f32 2.0, %v592_v58  ;;  %v775_v7 = vand.u32 2147483648, %v762_v56  ;;  %v773_v9 = vand.u32 2147483647, %v762_v56 }
 0x3bf   :  { %v956_v60 = vpop.eup %955  ;;  %vm769_vm7 = vweird.f32 %v762_v56 }
 0x3c0   :  { %v759_v62 = vadd.f32 %v956_v60, %v954_v59  ;;  %v958_v63 = vpop.eup %957  ;;  %v595_v0 = vadd.f32 0.1, %v593_v61  ;;  %v776_v12 = vor.u32 1.1754944e-38, %v775_v7 }
 0x3c1   :  { %v960_v2 = vpop.eup %959 }
 0x3c2   :  { %v761_v1 = vadd.f32 %v958_v63, %v759_v62  ;;  %597 = vst.msk [vmem:[#allocation12 + $0x8] sm:$0xff] %vm145_vm0, %v595_v0  ;;  %vm774_vm0 = vcmp.eq.f32.partialorder %v773_v9, 8.507059e+37 }
 0x3c3   :  { %839 = dma.vmem_to_hbm [thread:$0]  %s832_s30, 256, %s834_s21, [#allocation13], %s1146_s29, %s1146_s29, %s1147_s6  }
 0x3c4   :  { %v962_v3 = vpop.eup %961  ;;  %v763_v4 = vadd.f32 %v960_v2, %v761_v1 }
 0x3c5   :  { %v765_v5 = vmul.f32 %v962_v3, %v762_v56  ;;  %vm770_vm6 = vweird.f32 %v962_v3 }
 0x3c6   :  { %963 = vrcp.f32 %v763_v4  ;;  %vm771_vm8 = vmor %vm769_vm7, %vm770_vm6  ;;  %v790_v21 = vand.u32 2147483648, %v763_v4  ;;  %v788_v23 = vand.u32 2147483647, %v763_v4  ;;  %vm784_vm11 = vweird.f32 %v763_v4 }
 0x3c7   :  { %v766_v6 = vsub.f32 1.0, %v765_v5 }
 0x3c8   :  { %v791_v25 = vor.u32 1.1754944e-38, %v790_v21  ;;  %vm789_vm13 = vcmp.eq.f32.partialorder %v788_v23, 8.507059e+37 }
 0x3c9   :  { %v767_v8 = vmul.f32 %v962_v3, %v766_v6 }
 0x3cb   :  { %v768_v10 = vadd.f32 %v962_v3, %v767_v8 }
 0x3cc   :  { %v964_v11 = vpop.eup %963 }
 0x3cd   :  { %v772_v13 = vsel %vm771_vm8, %v962_v3, %v768_v10  ;;  %v780_v14 = vmul.f32 %v964_v11, %v763_v4  ;;  %vm785_vm10 = vweird.f32 %v964_v11 }
 0x3ce   :  { %v777_v15 = vsel %vm774_vm0, %v776_v12, %v772_v13  ;;  %vm786_vm12 = vmor %vm784_vm11, %vm785_vm10 }
 0x3cf   :  { %v794_v16 = vmul.f32 %v1484_v37, %v777_v15  ;;  %v799_v17 = vmul.f32 %v948_v42, %v777_v15  ;;  %v804_v18 = vmul.f32 %v950_v49, %v777_v15  ;;  %v809_v19 = vmul.f32 %v952_v54, %v777_v15 }
 0x3d0   :  { %v781_v20 = vsub.f32 1.0, %v780_v14 }
 0x3d1   :  { %797 = vst.msk [vmem:[%s1571_s23] sm:$0xff] %vm796_vm9, %v794_v16 }
 0x3d2   :  { %892 = vst.msk [vmem:[%s1571_s23 + $0x10] sm:$0xff] %vm796_vm9, %v799_v17  ;;  %v782_v22 = vmul.f32 %v964_v11, %v781_v20 }
 0x3d3   :  { %894 = vst.msk [vmem:[%s1571_s23 + $0x20] sm:$0xff] %vm796_vm9, %v804_v18 }
 0x3d4   :  { %896 = vst.msk [vmem:[%s1571_s23 + $0x30] sm:$0xff] %vm796_vm9, %v809_v19  ;;  %v783_v24 = vadd.f32 %v964_v11, %v782_v22 }
 0x3d6   :  { %v787_v26 = vsel %vm786_vm12, %v964_v11, %v783_v24 }
 0x3d7   :  { %v792_v27 = vsel %vm789_vm13, %v791_v25, %v787_v26 }
 0x3d8   :  { %v795_v29 = vmul.f32 %v954_v59, %v792_v27  ;;  %v800_v31 = vmul.f32 %v956_v60, %v792_v27  ;;  %v805_v32 = vmul.f32 %v958_v63, %v792_v27  ;;  %v810_v33 = vmul.f32 %v960_v2, %v792_v27 }
 0x3da   :  { %798 = vst.msk [vmem:[%s1571_s23 + $0x8] sm:$0xff] %vm796_vm9, %v795_v29 }
 0x3db   :  { %893 = vst.msk [vmem:[%s1571_s23 + $0x18] sm:$0xff] %vm796_vm9, %v800_v31 }
 0x3dc   :  { %895 = vst.msk [vmem:[%s1571_s23 + $0x28] sm:$0xff] %vm796_vm9, %v805_v32 }
 0x3dd   :  { %897 = vst.msk [vmem:[%s1571_s23 + $0x38] sm:$0xff] %vm796_vm9, %v810_v33 }
 0x3de   :  { %1139 = dma.done.wait [#allocation4], 256  }
 0x3df   :  { %1140 = vsyncadd [#allocation4], 4294967040 }
 0x3e0   :  { %1141 = dma.done.wait [#allocation13], 256  }
 0x3e1   :  { %1142 = vsyncadd [#allocation13], 4294967040 }
 0x3e2   :  { %852 = vsyncpa [#allocation3], 1 }
 0x3e3   :  { %853 = vsyncpa [#allocation6], 1 }
 0x3e4   :  { %854 = vsyncpa [#allocation9], 1 }
 0x3e5   :  { %855 = vsyncpa [#allocation4], 1 }
 0x3e6   :  { %856 = vsyncpa [#allocation13], 1 }

</bundles_post_ra>
